<compile_context>
chip_gen: v5e
topology: v5e:2x2
jax: 0.10.0
libtpu: 0.0.40
codegen_flags: <defaults>
</compile_context>

<pallas_src>
import functools

import jax
import jax.numpy as jnp
from jax.experimental import pallas as pl
from jax.experimental.pallas import tpu as pltpu


_TARGET_BLOCK_BYTES = 2 * 1024 * 1024   # ~2 MiB input blocks sit at ~86% HBM roofline
_VMEM_LIMIT_BYTES = 32 * 1024 * 1024    # safe on v5e/v6e (128 MiB phys) and v7x (64 MiB)


def _round_up(a, b):
    return ((a + b - 1) // b) * b


def _round_down(a, b):
    return (a // b) * b


def _mse_partial_kernel(x_ref, t_ref, part_ref, *, block_rows, lanes, valid_rows,
                        reduce_rows, ragged):
    """Streams one (block_rows, lanes) tile, accumulating sum((x-t)^2).

    part_ref's block index is constant over the reduction axis, so it is
    VMEM-resident: zero it at step 0 and accumulate directly (no scratch).
    """
    j = pl.program_id(0)

    @pl.when(j == 0)
    def _init():
        part_ref[...] = jnp.zeros_like(part_ref)

    # f32 subtract is exact for f32/bf16 inputs.  (On v7x bf16 streams one
    # could subtract in bf16 to relieve VALU pressure; skipped for exactness.)
    d = x_ref[...].astype(jnp.float32) - t_ref[...].astype(jnp.float32)
    dd = d * d

    def _accumulate(vals):
        if reduce_rows:
            # (R, L) -> (R//8, 8, L) keeps every (8,128) tile intact: the sum
            # over the leading axis is pure VPU adds, and the resident
            # accumulator / HBM writeback stays a tiny (8, L) slab.
            part_ref[...] += vals.reshape(block_rows // 8, 8, lanes).sum(axis=0)
        else:
            part_ref[...] += vals

    if ragged:
        last = pl.num_programs(0) - 1

        @pl.when(j != last)
        def _full():
            _accumulate(dd)

        @pl.when(j == last)
        def _partial():
            # Mask the rows of the (auto-padded) final block instead of
            # jnp.pad-ing the whole tensors on the host side.
            row = jax.lax.broadcasted_iota(jnp.int32, (block_rows, lanes), 0)
            mask = (j * block_rows + row) < valid_rows
            _accumulate(jnp.where(mask, dd, 0.0))
    else:
        _accumulate(dd)


def _mse_sum(x, target, *, max_block_rows=None):
    """Pallas streaming kernel: sum((x - target)^2) over all elements."""
    total = x.size
    itemsize = jnp.dtype(x.dtype).itemsize

    # Lane-dense last dim (multiple of 128) that divides the element count
    # -> reshape is free, no padding copy.
    lanes = None
    for cand in (512, 256, 128):
        if total % cand == 0:
            lanes = cand
            break

    xf = x.reshape(-1)
    tf = target.reshape(-1)
    if lanes is None:
        # Rare for NCHW conv feature maps: minimal zero-pad of both operands
        # (0 - 0 contributes nothing to the sum).
        lanes = 128
        padded = _round_up(total, lanes)
        xf = jnp.pad(xf, (0, padded - total))
        tf = jnp.pad(tf, (0, padded - total))

    m = xf.size // lanes
    x2 = xf.reshape(m, lanes)
    t2 = tf.reshape(m, lanes)

    # Sub-32-bit dtypes pack rows along sublanes: align rows to 16 (bf16) etc.
    row_align = 8 * max(1, 4 // itemsize)
    max_rows = max(row_align,
                   _round_down(_TARGET_BLOCK_BYTES // (lanes * itemsize), row_align))
    if max_block_rows is not None:   # test hook for exercising the ragged path
        max_rows = max(row_align, _round_down(min(max_rows, max_block_rows), row_align))

    if m <= max_rows:
        block_rows = m            # full-dim block: always legal, never ragged
        grid_steps = 1
        ragged = False
    else:
        block_rows = max_rows     # multiple of row_align
        grid_steps = pl.cdiv(m, block_rows)
        ragged = (m % block_rows) != 0

    reduce_rows = (block_rows % 8 == 0)
    out_rows = 8 if reduce_rows else block_rows

    kernel = functools.partial(
        _mse_partial_kernel,
        block_rows=block_rows, lanes=lanes, valid_rows=m,
        reduce_rows=reduce_rows, ragged=ragged)

    cost = pl.CostEstimate(
        flops=3 * total,
        transcendentals=0,
        bytes_accessed=2 * total * itemsize + out_rows * lanes * 4,
    )

    partials = pl.pallas_call(
        kernel,
        out_shape=jax.ShapeDtypeStruct((out_rows, lanes), jnp.float32),
        grid_spec=pltpu.PrefetchScalarGridSpec(
            num_scalar_prefetch=0,
            grid=(grid_steps,),
            in_specs=[
                pl.BlockSpec((block_rows, lanes), lambda j: (j, 0)),
                pl.BlockSpec((block_rows, lanes), lambda j: (j, 0)),
            ],
            out_specs=pl.BlockSpec((out_rows, lanes), lambda j: (0, 0)),
        ),
        compiler_params=pltpu.CompilerParams(
            dimension_semantics=("arbitrary",),
            vmem_limit_bytes=_VMEM_LIMIT_BYTES,
        ),
        cost_estimate=cost,
    )(x2, t2)

    return jnp.sum(partials)


def _content_loss_impl(x, target):
    assert x.shape == target.shape, "input / target shapes must match"
    loss = _mse_sum(x, target) * (1.0 / float(x.size))
    return x, loss


@jax.custom_vjp
def content_loss(x, target):
    """Functional mirror of ContentLoss.forward: returns (input, mse_loss)."""
    return _content_loss_impl(x, target)


def _content_loss_fwd(x, target):
    out, loss = _content_loss_impl(x, target)
    return (out, loss), (x, target)


def _content_loss_bwd(res, cts):
    x, target = res
    g_out, g_loss = cts
    diff = x.astype(jnp.float32) - target.astype(jnp.float32)
    g_mse = (g_loss * (2.0 / float(x.size))) * diff
    dx = (g_out.astype(jnp.float32) + g_mse).astype(x.dtype)
    dt = (-g_mse).astype(target.dtype)
    return dx, dt


content_loss.defvjp(_content_loss_fwd, _content_loss_bwd)


class ContentLoss:
    """JAX/Pallas mirror of the PyTorch module.

    Note: stashing `self.loss` as a side effect is fine in eager mode, but
    under jax.jit it would capture a tracer — use the functional
    `content_loss(x, target)` inside jitted code and carry the loss explicitly.
    """

    def __init__(self, target):
        self.target = jax.lax.stop_gradient(target)
        _, self.loss = content_loss(self.target, self.target)

    def __call__(self, x):
        out, self.loss = content_loss(x, self.target)
        return out


if __name__ == "__main__":
    key = jax.random.PRNGKey(0)
    k1, k2, k3, k4 = jax.random.split(key, 4)

    # Small NCHW feature-map shapes consistent with the module.
    N, C, H, W = 2, 4, 16, 16
    target = jax.random.normal(k1, (N, C, H, W), dtype=jnp.float32)
    x = jax.random.normal(k2, (N, C, H, W), dtype=jnp.float32)

    module = ContentLoss(target)
    out = jax.block_until_ready(module(x))
    loss = jax.block_until_ready(module.loss)

    # Sanity check against a pure-JAX reference.
    ref_loss = jnp.mean((x - target) ** 2)
    assert out.shape == x.shape and out.dtype == x.dtype
    assert jnp.allclose(out, x)
    assert jnp.allclose(loss, ref_loss, rtol=1e-5, atol=1e-6)

    # Functional / jitted path (no stateful side effect).
    out_j, loss_j = jax.jit(content_loss)(x, target)
    jax.block_until_ready(loss_j)
    assert jnp.allclose(loss_j, ref_loss, rtol=1e-5, atol=1e-6)

    # Gradient w.r.t. the input image (the whole point of NST) via custom_vjp.
    g = jax.block_until_ready(jax.grad(lambda inp: content_loss(inp, target)[1])(x))
    g_ref = 2.0 * (x - target) / float(x.size)
    assert jnp.allclose(g, g_ref, rtol=1e-5, atol=1e-6)

    # Exercise the in-kernel ragged-row masking path (m=12 rows, block=8, 2 steps).
    xr = jax.random.normal(k3, (6, 4, 16, 16), dtype=jnp.float32)
    tr = jax.random.normal(k4, (6, 4, 16, 16), dtype=jnp.float32)
    s_ragged = jax.block_until_ready(_mse_sum(xr, tr, max_block_rows=8))
    assert jnp.allclose(s_ragged, jnp.sum((xr - tr) ** 2), rtol=1e-5, atol=1e-4)

    # Exercise the rare non-multiple-of-128 fallback path.
    xs = jax.random.normal(k3, (1, 3, 10, 16), dtype=jnp.float32)
    ts = jax.random.normal(k4, (1, 3, 10, 16), dtype=jnp.float32)
    s_odd = jax.block_until_ready(_mse_sum(xs, ts))
    assert jnp.allclose(s_odd, jnp.sum((xs - ts) ** 2), rtol=1e-5, atol=1e-5)

    print("KERNEL_OK")
</pallas_src>

<mosaic_0001>
module attributes {stable_mosaic.version = 11 : i64} {
  func.func @_mse_partial_kernel(%arg0: i32, %arg1: memref<4x512xf32, #tpu.memory_space<vmem>>, %arg2: memref<4x512xf32, #tpu.memory_space<vmem>>, %arg3: memref<4x512xf32, #tpu.memory_space<vmem>>) attributes {dimension_semantics = [#tpu.dimension_semantics<arbitrary>], iteration_bounds = array<i64: 1>, scalar_prefetch = 0 : i64, scratch_operands = 0 : i64, tpu.core_type = #tpu.core_type<tc>, window_params = [{transform_indices = @transform_0, window_bounds = array<i64: 4, 512>}, {transform_indices = @transform_1, window_bounds = array<i64: 4, 512>}, {pipeline_mode = #tpu.pipeline_mode<synchronous>, transform_indices = @transform_2, window_bounds = array<i64: 4, 512>}]} {
    %c0_i32 = arith.constant 0 : i32
    %0 = arith.cmpi eq, %arg0, %c0_i32 : i32
    %1 = arith.extui %0 : i1 to i32
    %c0_i32_0 = arith.constant 0 : i32
    %2 = arith.cmpi ne, %1, %c0_i32_0 : i32
    scf.if %2 {
      %cst = arith.constant 0.000000e+00 : f32
      %10 = vector.broadcast %cst : f32 to vector<4x512xf32>
      %c0_8 = arith.constant 0 : index
      %c0_9 = arith.constant 0 : index
      %11 = vector.load %arg3[%c0_8, %c0_9] : memref<4x512xf32, #tpu.memory_space<vmem>>, vector<4x512xf32>
      tpu.vector_store %arg3[%c0_8, %c0_9], %10 {strides = array<i32>} : memref<4x512xf32, #tpu.memory_space<vmem>>, vector<4x512xf32>,
    } else {
    }
    %c0 = arith.constant 0 : index
    %c0_1 = arith.constant 0 : index
    %3 = vector.load %arg1[%c0, %c0_1] : memref<4x512xf32, #tpu.memory_space<vmem>>, vector<4x512xf32>
    %c0_2 = arith.constant 0 : index
    %c0_3 = arith.constant 0 : index
    %4 = vector.load %arg2[%c0_2, %c0_3] : memref<4x512xf32, #tpu.memory_space<vmem>>, vector<4x512xf32>
    %5 = arith.subf %3, %4 : vector<4x512xf32>
    %6 = arith.mulf %5, %5 : vector<4x512xf32>
    %c0_4 = arith.constant 0 : index
    %c0_5 = arith.constant 0 : index
    %7 = vector.load %arg3[%c0_4, %c0_5] : memref<4x512xf32, #tpu.memory_space<vmem>>, vector<4x512xf32>
    %8 = arith.addf %7, %6 : vector<4x512xf32>
    %c0_6 = arith.constant 0 : index
    %c0_7 = arith.constant 0 : index
    %9 = vector.load %arg3[%c0_6, %c0_7] : memref<4x512xf32, #tpu.memory_space<vmem>>, vector<4x512xf32>
    tpu.vector_store %arg3[%c0_6, %c0_7], %8 {strides = array<i32>} : memref<4x512xf32, #tpu.memory_space<vmem>>, vector<4x512xf32>,
    return
  }
  func.func @transform_0(%arg0: i32) -> (i32, i32) {
    %c0_i32 = arith.constant 0 : i32
    %c0_i32_0 = arith.constant 0 : i32
    return %arg0, %c0_i32 : i32, i32
  }
  func.func @transform_1(%arg0: i32) -> (i32, i32) {
    %c0_i32 = arith.constant 0 : i32
    %c0_i32_0 = arith.constant 0 : i32
    return %arg0, %c0_i32 : i32, i32
  }
  func.func @transform_2(%arg0: i32) -> (i32, i32) {
    %c0_i32 = arith.constant 0 : i32
    %c0_i32_0 = arith.constant 0 : i32
    %c0_i32_1 = arith.constant 0 : i32
    return %c0_i32, %c0_i32_0 : i32, i32
  }
}

</mosaic_0001>

<bundles_post_ra>
// kernel: tpu_custom_call.1
= control target key start
LH: loop header
LB: loop body
LE: loop exit
PB: predicated region body
PF: predicated region fallthrough
CT: control target
= control target key end

     0   :  { %7 = vsyncpa [#allocation3], 0  ;;  %s187_s0 = inlined_call_operand.hbm [shape: f32[4,512], index: 0, kind: input, shape index: {}]   ;;  %s188_s1 = inlined_call_operand.hbm [shape: f32[4,512], index: 1, kind: input, shape index: {}]   ;;  %s189_s2 = inlined_call_operand.hbm [shape: f32[4,512], index: 2, kind: output, shape index: {}]  }
   0x1   :  { %8 = vsyncpa [#allocation6], 0 }
   0x2   :  { %9 = vsyncpa [#allocation4], 0  ;;  %s15_s11 = sshll.u32 %s187_s0, 4  ;;  %s160_s12 = smov [#allocation2]   ;;  %s16_s11 = int_to_ptr.hbm [resolvable:$true] %s15_s11 }
   0x3   :  { %s17_s13 = sshll.u32 %s160_s12, 4  ;;  %s26_s16 = sshll.u32 %s188_s1, 4  ;;  %s18_s13 = int_to_ptr.vmem [resolvable:$true] %s17_s13  ;;  %s27_s16 = int_to_ptr.hbm [resolvable:$true] %s26_s16 }
   0x4   :  { %20 = dma.hbm_to_vmem [thread:$0]  %s16_s11, 256, %s18_s13, [#allocation3]  }
   0x5   :  { %s161_s17 = smov [#allocation5]  }
   0x6   :  { %s28_s18 = sshll.u32 %s161_s17, 4  ;;  %s29_s18 = int_to_ptr.vmem [resolvable:$true] %s28_s18 }
   0x7   :  { %31 = dma.hbm_to_vmem [thread:$0]  %s27_s16, 256, %s29_s18, [#allocation6]  }
   0x8   :  { %154 = dma.done.wait [#allocation3], 256  }
   0x9   :  { %155 = vsyncadd [#allocation3], 4294967040 }
   0xa   :  { %156 = dma.done.wait [#allocation6], 256  }
   0xb   :  { %157 = vsyncadd [#allocation6], 4294967040  ;;  %v46_v0 = vld [vmem:[#allocation2] sm:$0xff]  ;;  %v48_v1 = vld [vmem:[#allocation5] sm:$0xff]  ;;  %s162_s0 = smov [#allocation7]   ;;  %s67_s21 = sshll.u32 %s189_s2, 4  ;;  %s68_s21 = int_to_ptr.hbm [resolvable:$true] %s67_s21 }
   0xc   :  { %v47_v2 = vld [vmem:[#allocation2 + $0x8] sm:$0xff]  ;;  %v50_v3 = vsub.f32 %v46_v0, %v48_v1  ;;  %v49_v4 = vld [vmem:[#allocation5 + $0x8] sm:$0xff]  ;;  %s65_s19 = sshll.u32 %s162_s0, 4  ;;  %s66_s19 = int_to_ptr.vmem [resolvable:$true] %s65_s19 }
   0xd   :  { %v51_v5 = vsub.f32 %v47_v2, %v49_v4 }
   0xe   :  { %v52_v6 = vmul.f32 %v50_v3, %v50_v3 }
   0xf   :  { %v53_v7 = vmul.f32 %v51_v5, %v51_v5 }
  0x10   :  { %58 = vst [vmem:[#allocation7] sm:$0xff] %v52_v6 }
  0x11   :  { %59 = vst [vmem:[#allocation7 + $0x8] sm:$0xff] %v53_v7 }
  0x12   :  { %70 = dma.vmem_to_hbm [thread:$0]  %s66_s19, 256, %s68_s21, [#allocation4]  }
  0x13   :  { %158 = dma.done.wait [#allocation4], 256  }
  0x14   :  { %159 = vsyncadd [#allocation4], 4294967040 }
  0x15   :  { %75 = vsyncpa [#allocation3], 1 }
  0x16   :  { %76 = vsyncpa [#allocation6], 1 }
  0x17   :  { %77 = vsyncpa [#allocation4], 1 }

</bundles_post_ra>
